<compile_context>
chip_gen: v6e
topology: v6e:2x2x1
jax: 0.10.0
libtpu: 0.0.40
codegen_flags: <defaults>
</compile_context>

<pallas_src>
import functools

import jax
import jax.numpy as jnp
from jax.experimental import pallas as pl
from jax.experimental.pallas import tpu as pltpu

HIDDEN = 4096
NEG_SLOPE = 0.01          # torch.nn.LeakyReLU default
DROP_P = 0.2              # nn.Dropout(p=0.2)
LANE = 128
SUBLANE_BF16 = 16         # bf16 packs 16 rows per vreg
TH = 512                  # hidden-dim chunk streamed per grid step

_DROP_THRESH_24 = int(round(DROP_P * (1 << 24)))   # random words live in [0, 2^24)
_KEEP_SCALE = 1.0 / (1.0 - DROP_P)                 # 1.25, exact in bf16


def _round_up(x, m):
    return ((x + m - 1) // m) * m


def wide_classifier_kernel(*refs, training):
    if training:
        x_ref, w1_ref, b1_ref, w2_ref, b2_ref, bits_ref, o_ref, acc_ref = refs
    else:
        x_ref, w1_ref, b1_ref, w2_ref, b2_ref, o_ref, acc_ref = refs

    j = pl.program_id(1)

    # Layer 1 partial: [tm, k_pad] bf16 @ [k_pad, TH] bf16 -> f32 on the MXU.
    h = jnp.dot(x_ref[...], w1_ref[...], preferred_element_type=jnp.float32)
    h = h + b1_ref[...]                              # bias in f32

    # Elementwise path in bf16 (packed VPU on v6e/v7x; also the dtype layer 2 needs).
    h = h.astype(jnp.bfloat16)
    h = jnp.maximum(h, jnp.bfloat16(NEG_SLOPE) * h)  # LeakyReLU, no select

    if training:
        # Inverted dropout: externally supplied 24-bit uniform ints, integer
        # threshold compare, scale folded into the select.
        keep = bits_ref[...] >= jnp.int32(_DROP_THRESH_24)     # P(keep) = 1 - p
        h = jnp.where(keep, h * jnp.bfloat16(_KEEP_SCALE), jnp.bfloat16(0.0))

    @pl.when(j == 0)
    def _():
        acc_ref[...] = jnp.zeros_like(acc_ref)

    # Layer 2 partial over this hidden chunk, accumulated in f32.
    acc_ref[...] += jnp.dot(h, w2_ref[...], preferred_element_type=jnp.float32)

    @pl.when(j == pl.num_programs(1) - 1)
    def _():
        o_ref[...] = (acc_ref[...] + b2_ref[...]).astype(o_ref.dtype)


def prepare_params(w1, b1, w2, b2):
    """Pad to lane-dense shapes, store matmul weights as bf16 (done once)."""
    latent_dim = w1.shape[0]
    n_classes = w2.shape[1]
    k_pad = _round_up(latent_dim, LANE)
    n_pad = _round_up(n_classes, LANE)

    w1p = jnp.pad(w1.astype(jnp.bfloat16), ((0, k_pad - latent_dim), (0, 0)))
    b1p = b1.reshape(1, HIDDEN).astype(jnp.float32)
    w2p = jnp.pad(w2.astype(jnp.bfloat16), ((0, 0), (0, n_pad - n_classes)))
    b2p = jnp.pad(b2.reshape(1, -1).astype(jnp.float32),
                  ((0, 0), (0, n_pad - n_classes)))
    return (w1p, b1p, w2p, b2p)


@functools.partial(jax.jit, static_argnames=("n_classes", "training"))
def wide_classifier_forward(x, padded_params, dropout_key, *, n_classes,
                            training=False):
    w1, b1, w2, b2 = padded_params
    B, latent_dim = x.shape
    k_pad = w1.shape[0]
    n_pad = w2.shape[1]

    # Batch tile: multiple of 16 (bf16 sublanes); split into >=2 tiles for
    # B >= 32 so v7x's two TensorCores both get batch work.
    tm = min(128, _round_up(B, SUBLANE_BF16))
    if B >= 32 and _round_up(B, tm) == tm:
        tm = _round_up((B + 1) // 2, SUBLANE_BF16)
    b_pad = _round_up(B, tm)

    # Lane-dense, zero-padded bf16 input (jnp.pad fuses; no zeros+scatter copy).
    xp = jnp.pad(x.astype(jnp.bfloat16),
                 ((0, b_pad - B), (0, k_pad - latent_dim)))

    grid = (b_pad // tm, HIDDEN // TH)

    in_specs = [
        pl.BlockSpec((tm, k_pad), lambda i, j: (i, 0)),     # x tile (re-DMA only when i changes)
        pl.BlockSpec((k_pad, TH), lambda i, j: (0, j)),     # W1 chunk (streamed)
        pl.BlockSpec((1, TH), lambda i, j: (0, j)),         # b1 chunk
        pl.BlockSpec((TH, n_pad), lambda i, j: (j, 0)),     # W2 chunk (streamed)
        pl.BlockSpec((1, n_pad), lambda i, j: (0, 0)),      # b2 (resident)
    ]
    inputs = [xp, w1, b1, w2, b2]

    if training:
        # Dropout randomness generated with jax.random (works on TPU and in
        # interpret mode); 24-bit ints so the in-kernel compare is plain int32.
        bits = jax.random.bits(dropout_key, (b_pad, HIDDEN), jnp.uint32)
        bits24 = (bits >> jnp.uint32(8)).astype(jnp.int32)
        inputs.append(bits24)
        in_specs.append(pl.BlockSpec((tm, TH), lambda i, j: (i, j)))

    # VMEM budget from the actual tile footprint (double-buffered inputs/outputs
    # + scratch + elementwise intermediates), with ~1.5x headroom.
    footprint = (2 * tm * k_pad * 2          # x bf16
                 + 2 * k_pad * TH * 2        # W1 chunk bf16
                 + 2 * 8 * TH * 4            # b1 chunk f32 (sublane-padded)
                 + 2 * TH * n_pad * 2        # W2 chunk bf16
                 + 2 * 8 * n_pad * 4         # b2 f32
                 + 2 * tm * n_pad * 4        # out tile f32
                 + tm * n_pad * 4            # acc scratch
                 + 4 * tm * TH * 4)          # h intermediates headroom
    if training:
        footprint += 2 * tm * TH * 4         # random bits tile
    vmem_limit = min(max(footprint * 3 // 2, 16 * 1024 * 1024), 64 * 1024 * 1024)

    kernel = functools.partial(wide_classifier_kernel, training=training)

    out = pl.pallas_call(
        kernel,
        out_shape=jax.ShapeDtypeStruct((b_pad, n_pad), jnp.float32),
        grid_spec=pltpu.PrefetchScalarGridSpec(
            num_scalar_prefetch=0,
            grid=grid,
            in_specs=in_specs,
            out_specs=pl.BlockSpec((tm, n_pad), lambda i, j: (i, 0)),
            scratch_shapes=[pltpu.VMEM((tm, n_pad), jnp.float32)],
        ),
        compiler_params=pltpu.CompilerParams(
            dimension_semantics=("parallel", "arbitrary"),
            vmem_limit_bytes=vmem_limit,
        ),
    )(*inputs)

    return out[:B, :n_classes]


def wide_classifier_reference(x, padded_params, n_classes):
    """Plain-JAX reference mirroring the kernel's bf16-operand / f32-accum math."""
    w1, b1, w2, b2 = padded_params
    k_pad = w1.shape[0]
    latent_dim = x.shape[1]
    xp = jnp.pad(x.astype(jnp.bfloat16), ((0, 0), (0, k_pad - latent_dim)))
    h = jnp.dot(xp, w1, preferred_element_type=jnp.float32) + b1
    h = h.astype(jnp.bfloat16)
    h = jnp.maximum(h, jnp.bfloat16(NEG_SLOPE) * h)
    out = jnp.dot(h, w2, preferred_element_type=jnp.float32) + b2
    return out[:, :n_classes]


if __name__ == "__main__":
    batch = 8
    latent_dim = 32
    n_classes = 10

    key = jax.random.PRNGKey(0)
    key, kx, kw1, kb1, kw2, kb2, kdrop = jax.random.split(key, 7)
    x = jax.random.normal(kx, (batch, latent_dim), jnp.float32)

    # PyTorch nn.Linear-style init (uniform +-1/sqrt(fan_in)); weights stored
    # as (in_features, out_features) so the kernel computes h @ W + b.
    s1 = 1.0 / jnp.sqrt(jnp.float32(latent_dim))
    w1 = jax.random.uniform(kw1, (latent_dim, HIDDEN), jnp.float32, -s1, s1)
    b1 = jax.random.uniform(kb1, (HIDDEN,), jnp.float32, -s1, s1)
    s2 = 1.0 / jnp.sqrt(jnp.float32(HIDDEN))
    w2 = jax.random.uniform(kw2, (HIDDEN, n_classes), jnp.float32, -s2, s2)
    b2 = jax.random.uniform(kb2, (n_classes,), jnp.float32, -s2, s2)

    padded_params = prepare_params(w1, b1, w2, b2)

    # Eval mode (Dropout is a no-op) — checked against the reference.
    out_eval = wide_classifier_forward(x, padded_params, kdrop,
                                       n_classes=n_classes, training=False)
    jax.block_until_ready(out_eval)
    ref = wide_classifier_reference(x, padded_params, n_classes)
    assert out_eval.shape == (batch, n_classes)
    max_err = float(jnp.max(jnp.abs(out_eval - ref)))
    assert jnp.allclose(out_eval, ref, atol=2e-2, rtol=2e-2), max_err

    # Training mode — exercises the fused dropout path.
    out_train = wide_classifier_forward(x, padded_params, kdrop,
                                        n_classes=n_classes, training=True)
    jax.block_until_ready(out_train)
    assert out_train.shape == (batch, n_classes)
    assert bool(jnp.all(jnp.isfinite(out_train)))

    print("KERNEL_OK")
</pallas_src>

<mosaic_0001>
module attributes {stable_mosaic.version = 11 : i64} {
  func.func @wide_classifier_kernel(%arg0: i32, %arg1: i32, %arg2: memref<16x128xbf16, #tpu.memory_space<vmem>>, %arg3: memref<128x512xbf16, #tpu.memory_space<vmem>>, %arg4: memref<1x512xf32, #tpu.memory_space<vmem>>, %arg5: memref<512x128xbf16, #tpu.memory_space<vmem>>, %arg6: memref<1x128xf32, #tpu.memory_space<vmem>>, %arg7: memref<16x128xf32, #tpu.memory_space<vmem>>, %arg8: memref<16x128xf32, #tpu.memory_space<vmem>>) attributes {dimension_semantics = [#tpu.dimension_semantics<parallel>, #tpu.dimension_semantics<arbitrary>], iteration_bounds = array<i64: 1, 8>, scalar_prefetch = 0 : i64, scratch_operands = 1 : i64, tpu.core_type = #tpu.core_type<tc>, window_params = [{transform_indices = @transform_0, window_bounds = array<i64: 16, 128>}, {transform_indices = @transform_1, window_bounds = array<i64: 128, 512>}, {transform_indices = @transform_2, window_bounds = array<i64: 1, 512>}, {transform_indices = @transform_3, window_bounds = array<i64: 512, 128>}, {pipeline_mode = #tpu.pipeline_mode<synchronous>, transform_indices = @transform_4, window_bounds = array<i64: 1, 128>}, {transform_indices = @transform_5, window_bounds = array<i64: 16, 128>}]} {
    %c0 = arith.constant 0 : index
    %c0_0 = arith.constant 0 : index
    %0 = vector.load %arg2[%c0, %c0_0] : memref<16x128xbf16, #tpu.memory_space<vmem>>, vector<16x128xbf16>
    %c0_1 = arith.constant 0 : index
    %c0_2 = arith.constant 0 : index
    %1 = vector.load %arg3[%c0_1, %c0_2] : memref<128x512xbf16, #tpu.memory_space<vmem>>, vector<128x512xbf16>
    %cst = arith.constant dense<0.000000e+00> : vector<16x512xf32>
    %2 = tpu.matmul %0, %1, %cst {dimension_numbers = #tpu.dot_dimension_numbers<[1], [0], [0], [1], [0, 0, 1, 1], [], []>} : vector<16x128xbf16>, vector<128x512xbf16>, vector<16x512xf32> -> vector<16x512xf32>
    %c0_3 = arith.constant 0 : index
    %c0_4 = arith.constant 0 : index
    %3 = vector.load %arg4[%c0_3, %c0_4] : memref<1x512xf32, #tpu.memory_space<vmem>>, vector<1x512xf32>
    %4 = vector.broadcast %3 : vector<1x512xf32> to vector<16x512xf32>
    %5 = arith.addf %2, %4 : vector<16x512xf32>
    %6 = arith.truncf %5 : vector<16x512xf32> to vector<16x512xbf16>
    %cst_5 = arith.constant 1.000980e-02 : bf16
    %7 = vector.broadcast %cst_5 : bf16 to vector<16x512xbf16>
    %8 = arith.mulf %7, %6 : vector<16x512xbf16>
    %9 = arith.maximumf %6, %8 : vector<16x512xbf16>
    %c0_i32 = arith.constant 0 : i32
    %10 = arith.cmpi eq, %arg1, %c0_i32 : i32
    %11 = arith.extui %10 : i1 to i32
    %c0_i32_6 = arith.constant 0 : i32
    %12 = arith.cmpi ne, %11, %c0_i32_6 : i32
    scf.if %12 {
      %cst_15 = arith.constant 0.000000e+00 : f32
      %21 = vector.broadcast %cst_15 : f32 to vector<16x128xf32>
      %c0_16 = arith.constant 0 : index
      %c0_17 = arith.constant 0 : index
      %22 = vector.load %arg8[%c0_16, %c0_17] : memref<16x128xf32, #tpu.memory_space<vmem>>, vector<16x128xf32>
      tpu.vector_store %arg8[%c0_16, %c0_17], %21 {strides = array<i32>} : memref<16x128xf32, #tpu.memory_space<vmem>>, vector<16x128xf32>,
    } else {
    }
    %c0_7 = arith.constant 0 : index
    %c0_8 = arith.constant 0 : index
    %13 = vector.load %arg8[%c0_7, %c0_8] : memref<16x128xf32, #tpu.memory_space<vmem>>, vector<16x128xf32>
    %c0_9 = arith.constant 0 : index
    %c0_10 = arith.constant 0 : index
    %14 = vector.load %arg5[%c0_9, %c0_10] : memref<512x128xbf16, #tpu.memory_space<vmem>>, vector<512x128xbf16>
    %cst_11 = arith.constant dense<0.000000e+00> : vector<16x128xf32>
    %15 = tpu.matmul %9, %14, %cst_11 {dimension_numbers = #tpu.dot_dimension_numbers<[1], [0], [0], [1], [0, 0, 1, 1], [], []>} : vector<16x512xbf16>, vector<512x128xbf16>, vector<16x128xf32> -> vector<16x128xf32>
    %16 = arith.addf %13, %15 : vector<16x128xf32>
    %c0_12 = arith.constant 0 : index
    %c0_13 = arith.constant 0 : index
    %17 = vector.load %arg8[%c0_12, %c0_13] : memref<16x128xf32, #tpu.memory_space<vmem>>, vector<16x128xf32>
    tpu.vector_store %arg8[%c0_12, %c0_13], %16 {strides = array<i32>} : memref<16x128xf32, #tpu.memory_space<vmem>>, vector<16x128xf32>,
    %c7_i32 = arith.constant 7 : i32
    %18 = arith.cmpi eq, %arg1, %c7_i32 : i32
    %19 = arith.extui %18 : i1 to i32
    %c0_i32_14 = arith.constant 0 : i32
    %20 = arith.cmpi ne, %19, %c0_i32_14 : i32
    scf.if %20 {
      %c0_15 = arith.constant 0 : index
      %c0_16 = arith.constant 0 : index
      %21 = vector.load %arg8[%c0_15, %c0_16] : memref<16x128xf32, #tpu.memory_space<vmem>>, vector<16x128xf32>
      %c0_17 = arith.constant 0 : index
      %c0_18 = arith.constant 0 : index
      %22 = vector.load %arg6[%c0_17, %c0_18] : memref<1x128xf32, #tpu.memory_space<vmem>>, vector<1x128xf32>
      %23 = vector.broadcast %22 : vector<1x128xf32> to vector<16x128xf32>
      %24 = arith.addf %21, %23 : vector<16x128xf32>
      %c0_19 = arith.constant 0 : index
      %c0_20 = arith.constant 0 : index
      %25 = vector.load %arg7[%c0_19, %c0_20] : memref<16x128xf32, #tpu.memory_space<vmem>>, vector<16x128xf32>
      tpu.vector_store %arg7[%c0_19, %c0_20], %24 {strides = array<i32>} : memref<16x128xf32, #tpu.memory_space<vmem>>, vector<16x128xf32>,
    } else {
    }
    return
  }
  func.func @transform_0(%arg0: i32, %arg1: i32) -> (i32, i32) {
    %c0_i32 = arith.constant 0 : i32
    %c0_i32_0 = arith.constant 0 : i32
    return %arg0, %c0_i32 : i32, i32
  }
  func.func @transform_1(%arg0: i32, %arg1: i32) -> (i32, i32) {
    %c0_i32 = arith.constant 0 : i32
    %c0_i32_0 = arith.constant 0 : i32
    return %c0_i32, %arg1 : i32, i32
  }
  func.func @transform_2(%arg0: i32, %arg1: i32) -> (i32, i32) {
    %c0_i32 = arith.constant 0 : i32
    %c0_i32_0 = arith.constant 0 : i32
    return %c0_i32, %arg1 : i32, i32
  }
  func.func @transform_3(%arg0: i32, %arg1: i32) -> (i32, i32) {
    %c0_i32 = arith.constant 0 : i32
    %c0_i32_0 = arith.constant 0 : i32
    return %arg1, %c0_i32 : i32, i32
  }
  func.func @transform_4(%arg0: i32, %arg1: i32) -> (i32, i32) {
    %c0_i32 = arith.constant 0 : i32
    %c0_i32_0 = arith.constant 0 : i32
    %c0_i32_1 = arith.constant 0 : i32
    return %c0_i32, %c0_i32_0 : i32, i32
  }
  func.func @transform_5(%arg0: i32, %arg1: i32) -> (i32, i32) {
    %c0_i32 = arith.constant 0 : i32
    %c0_i32_0 = arith.constant 0 : i32
    return %arg0, %c0_i32 : i32, i32
  }
}

</mosaic_0001>

<bundles_post_ra>
// kernel: wide_classifier_forward.1
= control target key start
LH: loop header
LB: loop body
LE: loop exit
PB: predicated region body
PF: predicated region fallthrough
CT: control target
= control target key end

     0   :  { %10 = vsyncpa [#allocation4], 0  ;;  %s1889_s0 = inlined_call_operand.vmem [shape: bf16[16,128], index: 0, kind: input, shape index: {}]   ;;  %s1890_s1 = inlined_call_operand.hbm [shape: bf16[128,4096], index: 1, kind: input, shape index: {}]   ;;  %s1891_s2 = inlined_call_operand.hbm [shape: f32[1,4096], index: 2, kind: input, shape index: {}]   ;;  %s1892_s3 = inlined_call_operand.hbm [shape: bf16[4096,128], index: 3, kind: input, shape index: {}]   ;;  %s1893_s4 = inlined_call_operand.vmem [shape: f32[1,128], index: 4, kind: input, shape index: {}]   ;;  %s1894_s5 = inlined_call_operand.vmem [shape: f32[16,128], index: 5, kind: output, shape index: {}]  }
   0x1   :  { %12 = vsyncpa [#allocation4 + $0x1], 0 }
   0x2   :  { %13 = vsyncpa [#allocation6], 0 }
   0x3   :  { %15 = vsyncpa [#allocation6 + $0x1], 0  ;;  %s1647_s18 = smov 0   ;;  %s1649_s19 = smov 0  }
   0x4   :  { %s1651_s20 = smov 0   ;;  %s1653_s21 = smov 0  }
   0x5   :  { %s1655_s22 = smov 0   ;;  %s1657_s23 = smov 0  }
   0x6 LB: > { %s1895_s24 = sadd.s32 4294967295, %s1605_s23   ;;  %s30_s25 = sadd.s32 1, %s1601_s22  ;;  %s1605_s23 = sphi %s1657_s23, %s21_s23   ;;  %s1601_s22 = sphi %s1655_s22, %s1907_s22   ;;  %s1597_s21 = sphi %s1653_s21, %s1906_s21   ;;  %s1593_s20 = sphi %s1651_s20, %s1905_s20   ;;  %s1589_s19 = sphi %s1649_s19, %s1904_s19   ;;  %s1585_s18 = sphi %s1647_s18, %s1903_s18  }
   0x7   : > { %p31_p0 = scmp.ge.s32.totalorder %s30_s25, 8  ;;  %s66_s26 = sadd.s32 1, %s1593_s20 }
   0x8   : > { %p73_p1 = scmp.ne.s32.totalorder %s1593_s20, %s1589_s19  ;;  %p74_p2 = scmp.eq.s32.totalorder %s1605_s23, 0 }
   0x9   : > { %s1909_s25 = smov (%p31_p0, %s30_s25), 0  ;;  %p79_p4 = scmp.ne.s32.totalorder %s1589_s19, %s1585_s18 }
   0xa   : > { %1897 = sst [smem:[#allocation10_spill]] %s1909_s25  ;;  %p75_p3 = por %p74_p2, %p73_p1 }
   0xb   : > { %s63_s27 = ssub.s32 %s1601_s22, %s1909_s25  ;;  %p80_p5 = scmp.eq.s32.totalorder %s1895_s24, 0 }
   0xc   : > { %p64_p6 = scmp.eq.s32.totalorder %s63_s27, 0  ;;  %p1330_p8 = scmp.lt.s32.totalorder %s1605_s23, 8 }
   0xd   : > { %p1688_p7 = por %p80_p5, %p79_p4  ;;  %s1697_s30 = sand.u32 1, %s1593_s20  }
   0xe   : > { %s1694_s29 = scalar_select %p64_p6, %s1593_s20, %s66_s26  }
   0xf   : > { %p1699_p9 = pnand %p1330_p8, %p75_p3  ;;  %s1182_s7 = sshll.u32 %s1697_s30, 8 }
  0x10   : > { %s218_s8 = scalar_lea.vmem [#allocation3], %s1182_s7  ;;  %s235_s10 = sand.u32 1, %s1605_s23  }
  0x11   : > { %s225_s9 = sshll.u32 %s218_s8, 4  ;;  %s1185_s11 = sshll.u32 %s1697_s30, 2  ;;  %s1705_s9 = int_to_ptr.vmem [resolvable:$true] %s225_s9 }
  0x12   : > { %s1268_s12 = sshll.u32 %s1601_s22, 6  ;;  %s239_s16 = scalar_lea.vmem [#allocation5], %s1185_s11 }
  0x13   : > { %s245_s15 = scalar_lea.hbm %s1891_s2, %s1268_s12  ;;  %s247_s17 = sshll.u32 %s239_s16, 4  ;;  %s248_s17 = int_to_ptr.vmem [resolvable:$true] %s247_s17 }
  0x14   : > { %s258_s18 = scalar_lea.vmem [#allocation7], %s1182_s7  ;;  %s1712_s27 = scalar_lea.sflag [#allocation6], %s235_s10 }
  0x15   : > { %s265_s26 = sshll.u32 %s258_s18, 4  ;;  %p1469_p10 = pneg %p1699_p9  ;;  %s1722_s26 = int_to_ptr.vmem [resolvable:$true] %s265_s26 }
  0x16   : > { %s1480_s24 = scalar_lea.vmem %s248_s17, 64  ;;  %s1607_s8 = smov [#allocation5]  }
  0x17   : > { %p1481_p11 = scmp.ne.s32.totalorder %s248_s17, %s1480_s24  ;;  %s1485_s25 = sshll.u32 %s1607_s8, 4  ;;  %s1486_s25 = int_to_ptr.vmem [resolvable:$false] %s1485_s25 }
  0x18   : > { %s1487_s13 = scalar_lea.vmem %s1486_s25, 128  ;;  %p1488_p0 = scmp.lt.s32.totalorder %s248_s17, %s1486_s25 }
  0x19   : > { %p1483_p12 = pnand %p1481_p11, %p1469_p10  ;;  %p1489_p1 = scmp.lt.s32.totalorder %s1487_s13, %s1480_s24 }
  0x1b   : > { %p1484_p13 = pneg %p1483_p12  ;;  %p1490_p2 = por %p1489_p1, %p1488_p0 }
  0x1d   : > { %p1491_p3 = pnand %p1490_p2, %p1484_p13 }
  0x1f   : > { %1494 = shalt.err (!%p1491_p3)
}
  0x20   : > { %1326 = dma.hbm_to_vmem [thread:$0]  (!%p1699_p9), %s245_s15, 64, %s248_s17, %s1712_s27  }
  0x21   : > { %p1191_p4 = scmp.ge.s32.totalorder %s1605_s23, 1  ;;  %p273_p5 = scmp.lt.s32.totalorder %s1605_s23, 9 }
  0x22   : > { %s1267_s24 = sshll.u32 %s1601_s22, 8  ;;  %s1269_s12 = sshll.u32 %s1601_s22, 12 }
  0x23   : > { %p1727_p6 = pnand %p1191_p4, %p273_p5  ;;  %s224_s11 = scalar_lea.hbm %s1890_s1, %s1267_s24 }
  0x24   : > { %s215_s14 = scalar_lea.sflag [#allocation4], %s1697_s30  ;;  %s1508_s16 = scalar_lea.vmem %s1705_s9, 4096 }
  0x25   : > { %p1509_p8 = scmp.ne.s32.totalorder %s1705_s9, %s1508_s16  ;;  %s1608_s15 = smov [#allocation3]  }
  0x26   : > { %s1513_s17 = sshll.u32 %s1608_s15, 4  ;;  %s1514_s17 = int_to_ptr.vmem [resolvable:$false] %s1513_s17 }
  0x27   : > { %p1511_p11 = pnand %p1509_p8, %p1469_p10  ;;  %s1515_s18 = scalar_lea.vmem %s1514_s17, 8192 }
  0x28   : > { %p1516_p13 = scmp.lt.s32.totalorder %s1705_s9, %s1514_s17  ;;  %p1517_p0 = scmp.lt.s32.totalorder %s1515_s18, %s1508_s16 }
  0x29   : > { %p1512_p12 = pneg %p1511_p11 }
  0x2a   : > { %p1518_p1 = por %p1517_p0, %p1516_p13 }
  0x2c   : > { %p1519_p2 = pnand %p1518_p1, %p1512_p12 }
  0x2e   : > { %1522 = shalt.err (!%p1519_p2)
}
  0x2f   : > { %s1609_s8 = smov 2048   ;;  %s1610_s30 = smov 256  }
  0x30   : > { %s1611_s13 = smov 16   ;;  %s264_s10 = scalar_lea.hbm %s1892_s3, %s1269_s12 }
  0x31   : > { %1323 = dma.hbm_to_vmem [thread:$0]  (!%p1699_p9), %s224_s11, 4096, %s1705_s9, %s215_s14, %s1609_s8, %s1610_s30, %s1611_s13  }
  0x32   : > { %s1536_s15 = scalar_lea.vmem %s1722_s26, 4096  ;;  %s1612_s16 = smov [#allocation7]  }
  0x33   : > { %p1537_p3 = scmp.ne.s32.totalorder %s1722_s26, %s1536_s15  ;;  %s1541_s17 = sshll.u32 %s1612_s16, 4  ;;  %s1542_s17 = int_to_ptr.vmem [resolvable:$false] %s1541_s17 }
  0x34   : > { %s1543_s18 = scalar_lea.vmem %s1542_s17, 8192  ;;  %p1544_p8 = scmp.lt.s32.totalorder %s1722_s26, %s1542_s17 }
  0x35   : > { %p1539_p4 = pnand %p1537_p3, %p1469_p10  ;;  %p1545_p11 = scmp.lt.s32.totalorder %s1543_s18, %s1536_s15 }
  0x37   : > { %p1540_p5 = pneg %p1539_p4  ;;  %p1546_p12 = por %p1545_p11, %p1544_p8 }
  0x39   : > { %p1547_p13 = pnand %p1546_p12, %p1540_p5 }
  0x3b   : > { %1550 = shalt.err (!%p1547_p13)
}
  0x3c   : > { %s1613_s9 = smov 64   ;;  %s1614_s11 = smov 4  }
  0x3d   : > { %1329 = dma.hbm_to_vmem [thread:$0]  (!%p1699_p9), %s264_s10, 4096, %s1722_s26, %s1712_s27, %s1613_s9, %s1613_s9, %s1614_s11  }
  0x3e   : > { %277 = sbr.rel (%p1727_p6) target bundleno = 565 (0x235), region = 40  ;;  %s1761_s12 = sand.u32 (!%p1727_p6), 1, %s1589_s19  }
  0x3f   : > { %s1192_s14 = sshll.u32 (!%p1727_p6), %s1761_s12, 8  ;;  %s280_s8 = scalar_lea.sflag (!%p1727_p6), [#allocation4], %s1761_s12 }
  0x40   : > { %s1767_s30 = scalar_lea.vmem (!%p1727_p6), [#allocation3], %s1192_s14 }
  0x43   : > { %1576 = dma.done.wait (%p1688_p7), %s280_s8, 4096  }
  0x44   : > { %1578 = vsyncadd (%p1688_p7), %s280_s8, 4294963200  ;;  %s1901_s6 = sadd.s32 4294967295, %s1605_s23   ;;  %s1193_s27 = sshll.u32 %s1761_s12, 2 }
  0x45   : > { %s288_s26 = sand.u32 1, %s1901_s6   ;;  %s1776_s13 = scalar_lea.vmem [#allocation5], %s1193_s27 }
  0x46   : > { %s289_s25 = scalar_lea.sflag [#allocation6], %s288_s26 }
  0x47   : > { %1580 = dma.done.wait (%p1688_p7), %s289_s25, 4160  }
  0x48   : > { %1582 = vsyncadd (%p1688_p7), %s289_s25, 4294963136  ;;  %v1615_v0 = vmov 0   ;;  %v1386_v1 = vld [vmem:[%s1767_s30 + $0xe4] ss:$16 sps:$4 sm:$0xff]   ;;  %v1388_v2 = vld [vmem:[%s1767_s30 + $0xec] ss:$16 sps:$4 sm:$0xff]   ;;  %v396_v34 = vlaneseq }
  0x49   : > { %614 = vmatprep.mubr.bf16.mxu0 %v1615_v0  ;;  %657 = vmatprep.mubr.bf16.mxu1 %v1615_v0  ;;  %v1390_v3 = vld [vmem:[%s1767_s30 + $0xe0] ss:$16 sps:$4 sm:$0xff]   ;;  %v1391_v4 = vld [vmem:[%s1767_s30 + $0xe8] ss:$16 sps:$4 sm:$0xff]   ;;  %v1392_v5 = vld [vmem:[%s1767_s30 + $0xc4] ss:$16 sps:$4 sm:$0xff]  }
  0x4a   : > { %582 = vmatprep.subr.bf16.mxu0 %v1386_v1  ;;  %625 = vmatprep.subr.bf16.mxu1 %v1388_v2  ;;  %v1394_v6 = vld [vmem:[%s1767_s30 + $0xcc] ss:$16 sps:$4 sm:$0xff]   ;;  %v1396_v7 = vld [vmem:[%s1767_s30 + $0xc0] ss:$16 sps:$4 sm:$0xff]   ;;  %v1397_v8 = vld [vmem:[%s1767_s30 + $0xc8] ss:$16 sps:$4 sm:$0xff]  }
  0x4b   : > { %583 = vmatpush1.bf16.msra.mxu0 %v1390_v3  ;;  %626 = vmatpush1.bf16.msra.mxu1 %v1391_v4  ;;  %v1398_v9 = vld [vmem:[%s1767_s30 + $0xa4] ss:$16 sps:$4 sm:$0xff]   ;;  %v1400_v10 = vld [vmem:[%s1767_s30 + $0xac] ss:$16 sps:$4 sm:$0xff]   ;;  %v1402_v11 = vld [vmem:[%s1767_s30 + $0xa0] ss:$16 sps:$4 sm:$0xff]  }
  0x4c   : > { %584 = vmatprep.subr.bf16.mxu0 %v1392_v5  ;;  %627 = vmatprep.subr.bf16.mxu1 %v1394_v6  ;;  %v1403_v12 = vld [vmem:[%s1767_s30 + $0xa8] ss:$16 sps:$4 sm:$0xff]   ;;  %v1404_v13 = vld [vmem:[%s1767_s30 + $0x84] ss:$16 sps:$4 sm:$0xff]   ;;  %v1406_v14 = vld [vmem:[%s1767_s30 + $0x8c] ss:$16 sps:$4 sm:$0xff]  }
  0x4d   : > { %v1408_v15 = vld [vmem:[%s1767_s30 + $0x80] ss:$16 sps:$4 sm:$0xff]   ;;  %v1409_v16 = vld [vmem:[%s1767_s30 + $0x88] ss:$16 sps:$4 sm:$0xff]   ;;  %v1410_v17 = vld [vmem:[%s1767_s30 + $0x64] ss:$16 sps:$4 sm:$0xff]  }
  0x4e   : > { %v1412_v18 = vld [vmem:[%s1767_s30 + $0x6c] ss:$16 sps:$4 sm:$0xff]   ;;  %v1414_v19 = vld [vmem:[%s1767_s30 + $0x60] ss:$16 sps:$4 sm:$0xff]   ;;  %v1415_v20 = vld [vmem:[%s1767_s30 + $0x68] ss:$16 sps:$4 sm:$0xff]  }
  0x4f   : > { %585 = vmatpush1.bf16.msra.mxu0 %v1396_v7  ;;  %628 = vmatpush1.bf16.msra.mxu1 %v1397_v8  ;;  %v1416_v21 = vld [vmem:[%s1767_s30 + $0x44] ss:$16 sps:$4 sm:$0xff]   ;;  %v1418_v22 = vld [vmem:[%s1767_s30 + $0x4c] ss:$16 sps:$4 sm:$0xff]   ;;  %v1420_v23 = vld [vmem:[%s1767_s30 + $0x40] ss:$16 sps:$4 sm:$0xff]  }
  0x50   : > { %586 = vmatprep.subr.bf16.mxu0 %v1398_v9  ;;  %629 = vmatprep.subr.bf16.mxu1 %v1400_v10  ;;  %v1421_v24 = vld [vmem:[%s1767_s30 + $0x48] ss:$16 sps:$4 sm:$0xff]   ;;  %v1422_v25 = vld [vmem:[%s1767_s30 + $0x24] ss:$16 sps:$4 sm:$0xff]   ;;  %v1424_v26 = vld [vmem:[%s1767_s30 + $0x2c] ss:$16 sps:$4 sm:$0xff]  }
  0x51   : > { %v1426_v27 = vld [vmem:[%s1767_s30 + $0x20] ss:$16 sps:$4 sm:$0xff]   ;;  %v1427_v28 = vld [vmem:[%s1767_s30 + $0x28] ss:$16 sps:$4 sm:$0xff]   ;;  %v1428_v29 = vld [vmem:[%s1767_s30 + $0x4] ss:$16 sps:$4 sm:$0xff]  }
  0x52   : > { %v1430_v30 = vld [vmem:[%s1767_s30 + $0xc] ss:$16 sps:$4 sm:$0xff]   ;;  %v1432_v31 = vld [vmem:[%s1767_s30] ss:$16 sps:$4 sm:$0xff]   ;;  %v1433_v32 = vld [vmem:[%s1767_s30 + $0x8] ss:$16 sps:$4 sm:$0xff]  }
  0x53   : > { %587 = vmatpush1.bf16.msra.mxu0 %v1402_v11  ;;  %630 = vmatpush1.bf16.msra.mxu1 %v1403_v12  ;;  %v1434_v33 = vld [vmem:[%s1889_s0] sm:$0xff]   ;;  %v397_v35 = vshrl.u32 %v396_v34, 7  ;;  %v394_v38 = vld [vmem:[%s1776_s13] sm:$0xf]  ;;  %s1824_s7 = scalar_lea.vmem [#allocation7], %s1192_s14  ;;  %p1228_p7 = scmp.ne.s32.totalorder %s1597_s21, 0 }
  0x54   : > { %588 = vmatprep.subr.bf16.mxu0 %v1404_v13  ;;  %631 = vmatprep.subr.bf16.mxu1 %v1406_v14 }
  0x55   : > { %v398_v36 = vsub.s32 0, %v397_v35  ;;  %v406_v37 = vsub.s32 2, %v397_v35  ;;  %v402_v39 = vsub.s32 1, %v397_v35  ;;  %v410_v40 = vsub.s32 3, %v397_v35 }
  0x57   : > { %589 = vmatpush1.bf16.msra.mxu0 %v1408_v15  ;;  %632 = vmatpush1.bf16.msra.mxu1 %v1409_v16  ;;  %v399_v43 = vrot.slane %v394_v38, %v398_v36  ;;  %v407_v44 = vrot.slane %v394_v38, %v406_v37  ;;  %v403_v45 = vrot.slane %v394_v38, %v402_v39 }
  0x58   : > { %590 = vmatprep.subr.bf16.mxu0 %v1410_v17  ;;  %633 = vmatprep.subr.bf16.mxu1 %v1412_v18  ;;  %v411_v47 = vrot.slane %v394_v38, %v410_v40 }
  0x5b   : > { %591 = vmatpush1.bf16.msra.mxu0 %v1414_v19  ;;  %634 = vmatpush1.bf16.msra.mxu1 %v1415_v20 }
  0x5c   : > { %592 = vmatprep.subr.bf16.mxu0 %v1416_v21  ;;  %635 = vmatprep.subr.bf16.mxu1 %v1418_v22 }
  0x5f   : > { %593 = vmatpush1.bf16.msra.mxu0 %v1420_v23  ;;  %636 = vmatpush1.bf16.msra.mxu1 %v1421_v24 }
  0x60   : > { %594 = vmatprep.subr.bf16.mxu0 %v1422_v25  ;;  %637 = vmatprep.subr.bf16.mxu1 %v1424_v26 }
  0x63   : > { %595 = vmatpush1.bf16.msra.mxu0 %v1426_v27  ;;  %638 = vmatpush1.bf16.msra.mxu1 %v1427_v28 }
  0x64   : > { %596 = vmatprep.subr.bf16.mxu0 %v1428_v29  ;;  %639 = vmatprep.subr.bf16.mxu1 %v1430_v30 }
  0x67   : > { %597 = vmatpush1.bf16.msra.mxu0 %v1432_v31  ;;  %640 = vmatpush1.bf16.msra.mxu1 %v1433_v32 }
  0x6a   : > { %615 = vmatmul.mubr.bf16.vlgmr.msra.gmra.mxu0 %v1434_v33  ;;  %658 = vmatmul.mubr.bf16.vlgmr.msra.gmra.mxu1 %v1434_v33 }
 0x12a   : > { %v616_v41 = vpop.f32.mrf.mxu0  ;;  %v659_v42 = vpop.f32.mrf.mxu1 }
 0x12b   : > { %v617_v51 = vadd.f32 %v616_v41, %v399_v43  ;;  %v660_v52 = vadd.f32 %v659_v42, %v407_v44 }
 0x12c   : > { %v618_v46 = vpop.f32.mrf.mxu0  ;;  %v661_v48 = vpop.f32.mrf.mxu1 }
 0x12d   : > { %v619_v55 = vadd.f32 %v618_v46, %v403_v45  ;;  %v662_v56 = vadd.f32 %v661_v48, %v411_v47 }
 0x12e   : > { %v620_v49 = vpop.f32.mrf.mxu0  ;;  %v663_v50 = vpop.f32.mrf.mxu1 }
 0x12f   : > { %v621_v53 = vadd.f32 %v620_v49, %v399_v43  ;;  %v664_v54 = vadd.f32 %v663_v50, %v407_v44 }
 0x130   : > { %v622_v57 = vpop.f32.mrf.mxu0  ;;  %v665_v58 = vpop.f32.mrf.mxu1 }
 0x131   : > { %v668_v59 = vpack.c.bf16 %v621_v53, %v617_v51  ;;  %v670_v60 = vpack.c.bf16 %v664_v54, %v660_v52  ;;  %v623_v61 = vadd.f32 %v622_v57, %v403_v45  ;;  %v666_v62 = vadd.f32 %v665_v58, %v411_v47 }
 0x133   : > { %v672_v63 = vmul.bf16 1009007652, %v668_v59  ;;  %v674_v0 = vmul.bf16 1009007652, %v670_v60  ;;  %v669_v1 = vpack.c.bf16 %v623_v61, %v619_v55  ;;  %v671_v2 = vpack.c.bf16 %v666_v62, %v662_v56  ;;  %683 = sbr.rel (%p1228_p7) target bundleno = 314 (0x13a), region = 56 }
 0x135   : > { %v1818_v3 = vmax.bf16 %v672_v63, %v668_v59  ;;  %v1820_v4 = vmax.bf16 %v674_v0, %v670_v60  ;;  %v673_v5 = vmul.bf16 1009007652, %v669_v1  ;;  %v675_v6 = vmul.bf16 1009007652, %v671_v2 }
 0x137   : > { %v677_v7 = vmax.bf16 %v673_v5, %v669_v1  ;;  %v679_v8 = vmax.bf16 %v675_v6, %v671_v2 }
 0x138   : > { %v1616_v9 = vmov 0.0  }
 0x139   : > { %684 = vst [vmem:[#allocation2] sm:$0xff] %v1616_v9  ;;  %685 = vst [vmem:[#allocation2 + $0x8] sm:$0xff] %v1616_v9 }
 0x13a PF: > { %v1435_v10 = vld [vmem:[%s1824_s7 + $0x78] sm:$0xff]   ;;  %976 = vmatprep.mubr.bf16.mxu0 %v677_v7  ;;  %1017 = vmatprep.mubr.bf16.mxu1 %v679_v8  ;;  %v1439_v14 = vld [vmem:[%s1824_s7 + $0x70] sm:$0xff]   ;;  %v1443_v18 = vld [vmem:[%s1824_s7 + $0x68] sm:$0xff]   ;;  %p1261_p9 = scmp.ne.s32.totalorder %s1597_s21, 7 }
 0x13b   : > { %v1436_v11 = vld [vmem:[%s1824_s7 + $0xf8] sm:$0xff]   ;;  %1270 = vmatprep.subr.bf16.mxu0 %v1435_v10  ;;  %v1440_v15 = vld [vmem:[%s1824_s7 + $0xf0] sm:$0xff]   ;;  %v1444_v19 = vld [vmem:[%s1824_s7 + $0xe8] sm:$0xff]  }
 0x13c   : > { %v1437_v12 = vld [vmem:[%s1824_s7 + $0x38] sm:$0xff]   ;;  %1292 = vmatprep.subr.bf16.mxu1 %v1436_v11  ;;  %v1441_v16 = vld [vmem:[%s1824_s7 + $0x30] sm:$0xff]   ;;  %v1445_v20 = vld [vmem:[%s1824_s7 + $0x28] sm:$0xff]  }
 0x13d   : > { %v1438_v13 = vld [vmem:[%s1824_s7 + $0xb8] sm:$0xff]   ;;  %1271 = vmatpush3.bf16.msra.mxu0 %v1437_v12  ;;  %v1442_v17 = vld [vmem:[%s1824_s7 + $0xb0] sm:$0xff]   ;;  %v1446_v21 = vld [vmem:[%s1824_s7 + $0xa8] sm:$0xff]  }
 0x13e   : > { %1293 = vmatpush3.bf16.msra.mxu1 %v1438_v13  ;;  %1272 = vmatprep.subr.bf16.mxu0 %v1439_v14  ;;  %v1447_v22 = vld [vmem:[%s1824_s7 + $0x60] sm:$0xff]   ;;  %v1451_v26 = vld [vmem:[%s1824_s7 + $0x58] sm:$0xff]   ;;  %v1455_v30 = vld [vmem:[%s1824_s7 + $0x50] sm:$0xff]  }
 0x13f   : > { %1294 = vmatprep.subr.bf16.mxu1 %v1440_v15  ;;  %v1448_v23 = vld [vmem:[%s1824_s7 + $0xe0] sm:$0xff]   ;;  %v1452_v27 = vld [vmem:[%s1824_s7 + $0xd8] sm:$0xff]   ;;  %v1456_v31 = vld [vmem:[%s1824_s7 + $0xd0] sm:$0xff]  }
 0x140   : > { %v1449_v24 = vld [vmem:[%s1824_s7 + $0x20] sm:$0xff]   ;;  %v1453_v28 = vld [vmem:[%s1824_s7 + $0x18] sm:$0xff]   ;;  %v1457_v32 = vld [vmem:[%s1824_s7 + $0x10] sm:$0xff]  }
 0x141   : > { %1273 = vmatpush3.bf16.msra.mxu0 %v1441_v16  ;;  %v1450_v25 = vld [vmem:[%s1824_s7 + $0xa0] sm:$0xff]   ;;  %v1454_v29 = vld [vmem:[%s1824_s7 + $0x98] sm:$0xff]   ;;  %v1458_v33 = vld [vmem:[%s1824_s7 + $0x90] sm:$0xff]  }
 0x142   : > { %1295 = vmatpush3.bf16.msra.mxu1 %v1442_v17  ;;  %1274 = vmatprep.subr.bf16.mxu0 %v1443_v18  ;;  %v1459_v34 = vld [vmem:[%s1824_s7 + $0x48] sm:$0xff]   ;;  %v1463_v38 = vld [vmem:[%s1824_s7 + $0x40] sm:$0xff]   ;;  %v687_v57 = vld [vmem:[#allocation2 + $0x8] sm:$0xff] }
 0x143   : > { %1296 = vmatprep.subr.bf16.mxu1 %v1444_v19  ;;  %v1460_v35 = vld [vmem:[%s1824_s7 + $0xc8] sm:$0xff]   ;;  %v1464_v39 = vld [vmem:[%s1824_s7 + $0xc0] sm:$0xff]  }
 0x144   : > { %v1461_v36 = vld [vmem:[%s1824_s7 + $0x8] sm:$0xff]   ;;  %v1465_v40 = vld [vmem:[%s1824_s7] sm:$0xff]  }
 0x145   : > { %1275 = vmatpush3.bf16.msra.mxu0 %v1445_v20  ;;  %v1462_v37 = vld [vmem:[%s1824_s7 + $0x88] sm:$0xff]   ;;  %v1466_v41 = vld [vmem:[%s1824_s7 + $0x80] sm:$0xff]  }
 0x146   : > { %1297 = vmatpush3.bf16.msra.mxu1 %v1446_v21  ;;  %1276 = vmatprep.subr.bf16.mxu0 %v1447_v22  ;;  %v686_v49 = vld [vmem:[#allocation2] sm:$0xff] }
 0x147   : > { %1298 = vmatprep.subr.bf16.mxu1 %v1448_v23 }
 0x149   : > { %1277 = vmatpush3.bf16.msra.mxu0 %v1449_v24 }
 0x14a   : > { %1299 = vmatpush3.bf16.msra.mxu1 %v1450_v25  ;;  %1278 = vmatprep.subr.bf16.mxu0 %v1451_v26 }
 0x14b   : > { %1300 = vmatprep.subr.bf16.mxu1 %v1452_v27 }
 0x14d   : > { %1279 = vmatpush3.bf16.msra.mxu0 %v1453_v28 }
 0x14e   : > { %1301 = vmatpush3.bf16.msra.mxu1 %v1454_v29  ;;  %1280 = vmatprep.subr.bf16.mxu0 %v1455_v30 }
 0x14f   : > { %1302 = vmatprep.subr.bf16.mxu1 %v1456_v31 }
 0x151   : > { %1281 = vmatpush3.bf16.msra.mxu0 %v1457_v32 }
 0x152   : > { %1303 = vmatpush3.bf16.msra.mxu1 %v1458_v33  ;;  %1282 = vmatprep.subr.bf16.mxu0 %v1459_v34 }
 0x153   : > { %1304 = vmatprep.subr.bf16.mxu1 %v1460_v35 }
 0x155   : > { %1283 = vmatpush3.bf16.msra.mxu0 %v1461_v36 }
 0x156   : > { %1305 = vmatpush3.bf16.msra.mxu1 %v1462_v37  ;;  %1284 = vmatprep.subr.bf16.mxu0 %v1463_v38 }
 0x157   : > { %1306 = vmatprep.subr.bf16.mxu1 %v1464_v39 }
 0x159   : > { %1285 = vmatpush3.bf16.msra.mxu0 %v1465_v40 }
 0x15a   : > { %1307 = vmatpush3.bf16.msra.mxu1 %v1466_v41 }
 0x15c   : > { %977 = vmatmul.mubr.bf16.vlgmr.msra.gmra.mxu0 %v1818_v3 }
 0x15d   : > { %1018 = vmatmul.mubr.bf16.vlgmr.msra.gmra.mxu1 %v1820_v4 }
 0x21c   : > { %v1286_v42 = vpop.f32.mrf.mxu0 }
 0x21d   : > { %v1308_v43 = vpop.f32.mrf.mxu1 }
 0x21e   : > { %v1287_v44 = vpop.f32.mrf.mxu0 }
 0x21f   : > { %v1288_v45 = vadd.f32 %v1287_v44, %v1286_v42  ;;  %v1309_v46 = vpop.f32.mrf.mxu1 }
 0x220   : > { %v1310_v47 = vadd.f32 %v1309_v46, %v1308_v43  ;;  %v1289_v48 = vpop.f32.mrf.mxu0 }
 0x221   : > { %v1311_v50 = vpop.f32.mrf.mxu1 }
 0x222   : > { %v1020_v51 = vadd.f32 %v1310_v47, %v1288_v45  ;;  %v1290_v52 = vpop.f32.mrf.mxu0 }
 0x223   : > { %v1291_v53 = vadd.f32 %v1290_v52, %v1289_v48  ;;  %v1312_v54 = vpop.f32.mrf.mxu1 }
 0x224   : > { %v1026_v55 = vadd.f32 %v1020_v51, %v686_v49  ;;  %v1313_v56 = vadd.f32 %v1312_v54, %v1311_v50 }
 0x226   : > { %1028 = vst [vmem:[#allocation2] sm:$0xff] %v1026_v55  ;;  %v1023_v58 = vadd.f32 %v1313_v56, %v1291_v53  ;;  %1033 = sbr.rel (%p1261_p9) target bundleno = 565 (0x235), region = 60 }
 0x228   : > { %v1027_v59 = vadd.f32 %v1023_v58, %v687_v57 }
 0x22a   : > { %1029 = vst [vmem:[#allocation2 + $0x8] sm:$0xff] %v1027_v59 }
 0x22b   : > { %v1262_v61 = vld [vmem:[%s1893_s4] ss:$0 sm:$0xff] }
 0x22d   : > { %v1034_v60 = vld [vmem:[#allocation2] sm:$0xff] }
 0x22e   : > { %v1043_v63 = vadd.f32 %v1262_v61, %v1034_v60 }
 0x230   : > { %1045 = vst [vmem:[%s1894_s5] sm:$0xff] %v1043_v63 }
 0x231   : > { %v1035_v62 = vld [vmem:[#allocation2 + $0x8] sm:$0xff] }
 0x232   : > { %v1044_v0 = vadd.f32 %v1262_v61, %v1035_v62 }
 0x234   : > { %1046 = vst [vmem:[%s1894_s5 + $0x8] sm:$0xff] %v1044_v0 }
 0x235 PF: > { %s21_s23 = sadd.s32 1, %s1605_s23   ;;  %s1902_s11 = sld [smem:[#allocation10_spill]] }
 0x236   : > { %p18_p10 = scmp.ge.s32.totalorder %s21_s23, 10   ;;  %s1903_s18 = smov %s1589_s19 }
 0x237   : > { %s1904_s19 = smov %s1593_s20  ;;  %s1905_s20 = smov %s1694_s29 }
 0x238   : > { %s1906_s21 = smov %s1601_s22  ;;  %20 = sbr.rel (!%p18_p10) target bundleno = 6 (0x6), region = 115 }
 0x23b   : > { %s1907_s22 = smov %s1902_s11 }
 0x23d   :  { %1069 = vsyncpa [#allocation4], 1 }
 0x23e   :  { %1071 = vsyncpa [#allocation4 + $0x1], 1 }
 0x23f   :  { %1072 = vsyncpa [#allocation6], 1 }
 0x240   :  { %1074 = vsyncpa [#allocation6 + $0x1], 1 }

</bundles_post_ra>
